<compile_context>
chip_gen: v7x
topology: tpu7x:2x2x1
jax: 0.10.0
libtpu: 0.0.40
codegen_flags: <defaults>
</compile_context>

<pallas_src>
import jax
import jax.numpy as jnp
from jax.experimental import pallas as pl
from jax.experimental.pallas import tpu as pltpu


def _round_up(x, m):
    return (x + m - 1) // m * m


def _pick_row_tile(M, row_tile):
    """Pick the M (row) tile.

    Big M: fixed large tile (amortizes per-grid-step overhead, bounded VMEM).
    Medium M: aim for ~8 blocks and never collapse below 2 blocks -- a
    1-block grid disables software pipelining and v7x megacore sharding of
    the 'parallel' M axis.  Tiny M: a single full-extent block.
    """
    if M <= 16:
        return M                              # tiny: one full-extent block
    if M >= 2 * row_tile:
        return row_tile                       # many blocks: deep pipeline
    tm = _round_up(pl.cdiv(M, 8), 256)        # target ~8 blocks, 256-aligned
    if 2 * tm > M:                            # would leave < 2 blocks
        tm = _round_up(pl.cdiv(M, 2), 8)      # split in two instead
    return max(8, min(tm, row_tile))


def _patch_embed_kernel(x_ref, w_ref, b_ref, o_ref):
    # x_ref: (tm, Kp) patch rows   w_ref: (Kp, Np) flattened conv weight
    # b_ref: (1, Np) f32 bias      o_ref: (tm, Np) output tile
    acc = jnp.dot(x_ref[...], w_ref[...], preferred_element_type=jnp.float32)
    o_ref[...] = (acc + b_ref[...]).astype(o_ref.dtype)


def patch_embed(x, weight, bias, patch_size, *,
                compute_dtype=jnp.bfloat16, out_dtype=None,
                row_tile=1024, vmem_limit_bytes=None):
    """PatchEmbed forward.

    x:      (B, C, H, W)            -- NCHW, same as PyTorch
    weight: (embed_dim, C, ph, pw)  -- nn.Conv2d weight
    bias:   (embed_dim,)            -- nn.Conv2d bias
    returns (B, num_patches, embed_dim) in out_dtype (default: x.dtype)
    """
    ph, pw = patch_size
    B, C, H, W = x.shape
    assert H % ph == 0 and W % pw == 0, "image size must be divisible by patch size"
    gh, gw = H // ph, W // pw
    num_patches = gh * gw
    embed_dim = weight.shape[0]
    K = C * ph * pw
    M = B * num_patches
    out_dtype = x.dtype if out_dtype is None else out_dtype

    # --- patch extraction: (B,C,H,W) -> (M, K) ------------------------------
    # Cast to compute dtype first so any materialized repack copy is bf16
    # (half the HBM bytes); allow_input_fusion lets XLA fuse this transpose
    # into the pallas input fetch when possible.
    patches = x.astype(compute_dtype).reshape(B, C, gh, ph, gw, pw)
    patches = jnp.transpose(patches, (0, 2, 4, 1, 3, 5)).reshape(M, K)

    # Conv weight (embed_dim, C, ph, pw) -> (K, embed_dim); flatten order
    # (C, ph, pw) matches the patch flatten order, so this is exactly the
    # stride=kernel_size Conv2d.  Bias stays f32 (added after f32 accum).
    w2d = weight.reshape(embed_dim, K).T.astype(compute_dtype)
    b2d = bias.reshape(1, embed_dim).astype(jnp.float32)

    # --- TPU-friendly padding ------------------------------------------------
    # Lane-dense output: embed_dim up to a multiple of 128 (unmasked vst).
    # Keep it at 128 multiples (NOT 256): over-padding e.g. 384->512 would add
    # 33% MXU work + output bytes for no gain.
    n_pad = _round_up(embed_dim, 128)
    # Aligned contraction dim for bf16 packing / full MXU passes.  No-op for
    # common ViT shapes (K = 768, 588->640 only for patch14/C=3 style shapes).
    k_pad = _round_up(K, 128)
    if k_pad != K:
        patches = jnp.pad(patches, ((0, 0), (0, k_pad - K)))
        w2d = jnp.pad(w2d, ((0, k_pad - K), (0, 0)))
    if n_pad != embed_dim:
        w2d = jnp.pad(w2d, ((0, 0), (0, n_pad - embed_dim)))
        b2d = jnp.pad(b2d, ((0, 0), (0, n_pad - embed_dim)))

    # --- tiling: M axis only; ragged last block handled by Pallas -----------
    tm = _pick_row_tile(M, row_tile)
    grid = (pl.cdiv(M, tm),)

    # TODO(synk): if K = C*ph*pw ever outgrows the VMEM budget, add a K grid
    # axis marked "arbitrary" with an f32 VMEM accumulator.

    in_bytes = jnp.dtype(compute_dtype).itemsize
    out_bytes = jnp.dtype(out_dtype).itemsize
    cost = pl.CostEstimate(
        flops=2 * M * k_pad * n_pad,
        bytes_accessed=(M * k_pad * in_bytes + k_pad * n_pad * in_bytes
                        + n_pad * 4 + M * n_pad * out_bytes),
        transcendentals=0,
    )

    cp_kwargs = dict(
        # Single M grid axis; "parallel" -> megacore sharding on v7x.
        dimension_semantics=("parallel",),
        # Let XLA fuse the patch transpose/cast into the input fetch.
        allow_input_fusion=[True, False, False],
    )
    if vmem_limit_bytes is not None:
        cp_kwargs["vmem_limit_bytes"] = vmem_limit_bytes

    out = pl.pallas_call(
        _patch_embed_kernel,
        out_shape=jax.ShapeDtypeStruct((M, n_pad), out_dtype),
        grid_spec=pltpu.PrefetchScalarGridSpec(
            num_scalar_prefetch=0,
            grid=grid,
            in_specs=[
                pl.BlockSpec((tm, k_pad), lambda i: (i, 0)),
                # Weight / bias index_maps are grid-invariant: Pallas does not
                # re-DMA them across steps.
                pl.BlockSpec((k_pad, n_pad), lambda i: (0, 0)),
                pl.BlockSpec((1, n_pad), lambda i: (0, 0)),
            ],
            out_specs=pl.BlockSpec((tm, n_pad), lambda i: (i, 0)),
        ),
        compiler_params=pltpu.CompilerParams(**cp_kwargs),
        cost_estimate=cost,
    )(patches, w2d, b2d)

    if n_pad != embed_dim:
        out = out[:, :embed_dim]
    return out.reshape(B, num_patches, embed_dim)


if __name__ == "__main__":
    def _ref(x, weight, bias, ph, pw):
        B = x.shape[0]
        e = weight.shape[0]
        y = jax.lax.conv_general_dilated(
            x, weight, window_strides=(ph, pw), padding="VALID",
            dimension_numbers=("NCHW", "OIHW", "NCHW"))
        y = y + bias[None, :, None, None]
        return y.reshape(B, e, -1).transpose(0, 2, 1)

    key = jax.random.PRNGKey(0)

    # --- Case 1: small shapes consistent with the module spec ---------------
    # img_size=16, patch_size=8, in_chans=4, embed_dim=32 -> num_patches=4
    B, C, H, W = 2, 4, 16, 16
    ph = pw = 8
    embed_dim = 32
    k1, k2, k3, key = jax.random.split(key, 4)
    x = jax.random.normal(k1, (B, C, H, W), dtype=jnp.float32)
    w = jax.random.normal(k2, (embed_dim, C, ph, pw), dtype=jnp.float32) * 0.02
    b = jax.random.normal(k3, (embed_dim,), dtype=jnp.float32) * 0.02

    out_f32 = jax.block_until_ready(
        patch_embed(x, w, b, (ph, pw), compute_dtype=jnp.float32))
    out_bf16 = jax.block_until_ready(patch_embed(x, w, b, (ph, pw)))
    ref1 = _ref(x, w, b, ph, pw)
    npat = (H // ph) * (W // pw)
    assert out_f32.shape == (B, npat, embed_dim)
    assert out_f32.dtype == x.dtype
    assert out_bf16.shape == (B, npat, embed_dim)
    assert jnp.allclose(out_f32, ref1, atol=1e-4, rtol=1e-4)
    # bf16 matmul inputs, f32 accumulation: only input-rounding error remains.
    assert jnp.allclose(out_bf16, ref1, atol=2e-2, rtol=2e-2)

    # --- Case 2: exercises K-padding (K=192->256), ragged M grid (M=40 split
    #     into 2 blocks) and the bf16-output path ----------------------------
    B2, C2, H2, W2 = 2, 3, 40, 32
    e2 = 48
    k1, k2, k3, key = jax.random.split(key, 4)
    x2 = jax.random.normal(k1, (B2, C2, H2, W2), dtype=jnp.float32)
    w2 = jax.random.normal(k2, (e2, C2, ph, pw), dtype=jnp.float32) * 0.02
    b2 = jax.random.normal(k3, (e2,), dtype=jnp.float32) * 0.02
    out2 = jax.block_until_ready(
        patch_embed(x2, w2, b2, (ph, pw), out_dtype=jnp.bfloat16))
    ref2 = _ref(x2, w2, b2, ph, pw)
    npat2 = (H2 // ph) * (W2 // pw)
    assert out2.shape == (B2, npat2, e2)
    assert out2.dtype == jnp.bfloat16
    assert jnp.allclose(out2.astype(jnp.float32), ref2, atol=5e-2, rtol=5e-2)

    print("KERNEL_OK")
</pallas_src>

<mosaic_0001>
module attributes {stable_mosaic.version = 11 : i64} {
  func.func @_patch_embed_kernel(%arg0: i32, %arg1: memref<8x256xf32, #tpu.memory_space<vmem>>, %arg2: memref<256x128xf32, #tpu.memory_space<vmem>>, %arg3: memref<1x128xf32, #tpu.memory_space<vmem>>, %arg4: memref<8x128xf32, #tpu.memory_space<vmem>>) attributes {dimension_semantics = [#tpu.dimension_semantics<parallel>], iteration_bounds = array<i64: 1>, scalar_prefetch = 0 : i64, scratch_operands = 0 : i64, tpu.core_type = #tpu.core_type<tc>, window_params = [{transform_indices = @transform_0, window_bounds = array<i64: 8, 256>}, {pipeline_mode = #tpu.pipeline_mode<synchronous>, transform_indices = @transform_1, window_bounds = array<i64: 256, 128>}, {pipeline_mode = #tpu.pipeline_mode<synchronous>, transform_indices = @transform_2, window_bounds = array<i64: 1, 128>}, {transform_indices = @transform_3, window_bounds = array<i64: 8, 128>}]} {
    %c0 = arith.constant 0 : index
    %c0_0 = arith.constant 0 : index
    %0 = vector.load %arg1[%c0, %c0_0] : memref<8x256xf32, #tpu.memory_space<vmem>>, vector<8x256xf32>
    %c0_1 = arith.constant 0 : index
    %c0_2 = arith.constant 0 : index
    %1 = vector.load %arg2[%c0_1, %c0_2] : memref<256x128xf32, #tpu.memory_space<vmem>>, vector<256x128xf32>
    %cst = arith.constant dense<0.000000e+00> : vector<8x128xf32>
    %2 = tpu.matmul %0, %1, %cst {dimension_numbers = #tpu.dot_dimension_numbers<[1], [0], [0], [1], [0, 0, 1, 1], [], []>} : vector<8x256xf32>, vector<256x128xf32>, vector<8x128xf32> -> vector<8x128xf32>
    %c0_3 = arith.constant 0 : index
    %c0_4 = arith.constant 0 : index
    %3 = vector.load %arg3[%c0_3, %c0_4] : memref<1x128xf32, #tpu.memory_space<vmem>>, vector<1x128xf32>
    %4 = vector.broadcast %3 : vector<1x128xf32> to vector<8x128xf32>
    %5 = arith.addf %2, %4 : vector<8x128xf32>
    %c0_5 = arith.constant 0 : index
    %c0_6 = arith.constant 0 : index
    %6 = vector.load %arg4[%c0_5, %c0_6] : memref<8x128xf32, #tpu.memory_space<vmem>>, vector<8x128xf32>
    tpu.vector_store %arg4[%c0_5, %c0_6], %5 {strides = array<i32>} : memref<8x128xf32, #tpu.memory_space<vmem>>, vector<8x128xf32>,
    return
  }
  func.func @transform_0(%arg0: i32) -> (i32, i32) {
    %c0_i32 = arith.constant 0 : i32
    %c0_i32_0 = arith.constant 0 : i32
    return %arg0, %c0_i32 : i32, i32
  }
  func.func @transform_1(%arg0: i32) -> (i32, i32) {
    %c0_i32 = arith.constant 0 : i32
    %c0_i32_0 = arith.constant 0 : i32
    %c0_i32_1 = arith.constant 0 : i32
    return %c0_i32, %c0_i32_0 : i32, i32
  }
  func.func @transform_2(%arg0: i32) -> (i32, i32) {
    %c0_i32 = arith.constant 0 : i32
    %c0_i32_0 = arith.constant 0 : i32
    %c0_i32_1 = arith.constant 0 : i32
    return %c0_i32, %c0_i32_0 : i32, i32
  }
  func.func @transform_3(%arg0: i32) -> (i32, i32) {
    %c0_i32 = arith.constant 0 : i32
    %c0_i32_0 = arith.constant 0 : i32
    return %arg0, %c0_i32 : i32, i32
  }
}

</mosaic_0001>

<bundles_post_ra>
// kernel: tpu_custom_call.1
= control target key start
LH: loop header
LB: loop body
LE: loop exit
PB: predicated region body
PF: predicated region fallthrough
CT: control target
= control target key end

     0   :  { %8 = vsyncpa [#allocation3], 0  ;;  %s385_s0 = inlined_call_operand.hbm [shape: f32[8,256], index: 0, kind: input, shape index: {}]   ;;  %s386_s1 = inlined_call_operand.hbm [shape: f32[256,128], index: 1, kind: input, shape index: {}]   ;;  %s387_s2 = inlined_call_operand.vmem [shape: f32[1,128], index: 2, kind: input, shape index: {}]   ;;  %s388_s3 = inlined_call_operand.hbm [shape: f32[8,128], index: 3, kind: output, shape index: {}]  }
   0x1   :  { %9 = vsyncpa [#allocation6], 0 }
   0x2   :  { %10 = vsyncpa [#allocation4], 0  ;;  %s314_s12 = smov [#allocation2]   ;;  %s315_s14 = smov [#allocation5]  }
   0x3   :  { %s17_s13 = sshll.u32 %s314_s12, 4  ;;  %s26_s15 = sshll.u32 %s315_s14, 4  ;;  %s18_s13 = int_to_ptr.vmem [resolvable:$true] %s17_s13  ;;  %s339_s15 = int_to_ptr.vmem [resolvable:$true] %s26_s15 }
   0x4   :  { %s242_s18 = scalar_lea.hbm %s385_s0, 256 }
   0x5   :  { %p243_p0 = scmp.ne.s32.totalorder %s385_s0, %s242_s18  ;;  %p246_p1 = scmp.lt.u32.totalorder %s242_s18, %s385_s0 }
   0x7   :  { %p248_p2 = pnand %p246_p1, %p243_p0 }
   0x9   :  { %251 = shalt.err (!%p248_p2)
}
   0xa   :  { %s252_s23 = scalar_lea.vmem %s18_s13, 256  ;;  %p257_p4 = scmp.lt.s32.totalorder %s18_s13, %s18_s13 }
   0xb   :  { %p253_p3 = scmp.ne.s32.totalorder %s18_s13, %s252_s23  ;;  %p258_p5 = scmp.lt.s32.totalorder %s252_s23, %s252_s23 }
   0xd   :  { %p259_p6 = por %p258_p5, %p257_p4 }
   0xf   :  { %p260_p7 = pnand %p259_p6, %p253_p3 }
  0x11   :  { %263 = shalt.err (!%p260_p7)
}
  0x12   :  { %20 = dma.hbm_to_vmem [thread:$0]  %s385_s0, 256, %s18_s13, [#allocation3]  }
  0x13   :  { %s264_s28 = scalar_lea.hbm %s386_s1, 4096 }
  0x14   :  { %p265_p8 = scmp.ne.s32.totalorder %s386_s1, %s264_s28  ;;  %p268_p9 = scmp.lt.u32.totalorder %s264_s28, %s386_s1 }
  0x16   :  { %p270_p10 = pnand %p268_p9, %p265_p8 }
  0x18   :  { %273 = shalt.err (!%p270_p10)
}
  0x19   :  { %s274_s6 = scalar_lea.vmem %s339_s15, 4096  ;;  %p279_p12 = scmp.lt.s32.totalorder %s339_s15, %s339_s15 }
  0x1a   :  { %p275_p11 = scmp.ne.s32.totalorder %s339_s15, %s274_s6  ;;  %p280_p13 = scmp.lt.s32.totalorder %s274_s6, %s274_s6 }
  0x1c   :  { %p281_p0 = por %p280_p13, %p279_p12 }
  0x1e   :  { %p282_p1 = pnand %p281_p0, %p275_p11 }
  0x20   :  { %285 = shalt.err (!%p282_p1)
}
  0x21   :  { %s316_s0 = smov 128   ;;  %s317_s7 = smov 8  }
  0x22   :  { %32 = dma.hbm_to_vmem [thread:$0]  %s386_s1, 4096, %s339_s15, [#allocation6], %s316_s0, %s316_s0, %s317_s7  }
  0x23   :  { %308 = dma.done.wait [#allocation3], 256  }
  0x24   :  { %309 = vsyncadd [#allocation3], 4294967040 }
  0x25   :  { %310 = dma.done.wait [#allocation6], 4096  }
  0x26   :  { %311 = vsyncadd [#allocation6], 4294963200  ;;  %v59_v0 = vld [vmem:[#allocation5 + $0x80] sm:$0xff]  ;;  %v60_v1 = vld [vmem:[#allocation5 + $0x88] sm:$0xff]  ;;  %s318_s11 = smov [#allocation7]  }
  0x27   :  { %v43_v2 = vld [vmem:[#allocation5] sm:$0xff]  ;;  %v205_v3 = vpack.c.bf16 %v60_v1, %v59_v0  ;;  %v44_v4 = vld [vmem:[#allocation5 + $0x8] sm:$0xff]  ;;  %v61_v5 = vld [vmem:[#allocation5 + $0x90] sm:$0xff]  ;;  %s159_s12 = sshll.u32 %s318_s11, 4  ;;  %s160_s12 = int_to_ptr.vmem [resolvable:$true] %s159_s12 }
  0x28   :  { %v62_v6 = vld [vmem:[#allocation5 + $0x98] sm:$0xff]  ;;  %v207_v7 = vpack.c.bf16 %v44_v4, %v43_v2  ;;  %v45_v9 = vld [vmem:[#allocation5 + $0x10] sm:$0xff]  ;;  %v63_v11 = vld [vmem:[#allocation5 + $0xa0] sm:$0xff]  ;;  %s286_s13 = scalar_lea.vmem %s160_s12, 128  ;;  %p291_p3 = scmp.lt.s32.totalorder %s160_s12, %s160_s12 }
  0x29   :  { %v209_v8 = vpack.c.bf16 %v62_v6, %v61_v5  ;;  %v46_v10 = vld [vmem:[#allocation5 + $0x18] sm:$0xff]  ;;  %206 = vmatprep.subr.bf16.mxu0 %v205_v3  ;;  %v64_v12 = vld [vmem:[#allocation5 + $0xa8] sm:$0xff]  ;;  %v47_v15 = vld [vmem:[#allocation5 + $0x20] sm:$0xff]  ;;  %p287_p2 = scmp.ne.s32.totalorder %s160_s12, %s286_s13  ;;  %p292_p4 = scmp.lt.s32.totalorder %s286_s13, %s286_s13 }
  0x2a   :  { %208 = vmatpush3.bf16.msra.mxu0 %v207_v7  ;;  %v211_v13 = vpack.c.bf16 %v46_v10, %v45_v9  ;;  %v213_v14 = vpack.c.bf16 %v64_v12, %v63_v11  ;;  %v48_v16 = vld [vmem:[#allocation5 + $0x28] sm:$0xff]  ;;  %v65_v17 = vld [vmem:[#allocation5 + $0xb0] sm:$0xff]  ;;  %v66_v18 = vld [vmem:[#allocation5 + $0xb8] sm:$0xff] }
  0x2b   :  { %210 = vmatprep.subr.bf16.mxu0 %v209_v8  ;;  %v215_v19 = vpack.c.bf16 %v48_v16, %v47_v15  ;;  %v217_v20 = vpack.c.bf16 %v66_v18, %v65_v17  ;;  %v49_v21 = vld [vmem:[#allocation5 + $0x30] sm:$0xff]  ;;  %v50_v22 = vld [vmem:[#allocation5 + $0x38] sm:$0xff]  ;;  %v67_v23 = vld [vmem:[#allocation5 + $0xc0] sm:$0xff]  ;;  %p293_p5 = por %p292_p4, %p291_p3 }
  0x2c   :  { %v68_v24 = vld [vmem:[#allocation5 + $0xc8] sm:$0xff]  ;;  %v42_v25 = vld [vmem:[#allocation2 + $0x8] sm:$0xff]  ;;  %v219_v26 = vpack.c.bf16 %v50_v22, %v49_v21  ;;  %v51_v28 = vld [vmem:[#allocation5 + $0x40] sm:$0xff] }
  0x2d   :  { %146 = vmatprep.mubr.f32.mxu0 %v42_v25  ;;  %v221_v27 = vpack.c.bf16 %v68_v24, %v67_v23  ;;  %v52_v29 = vld [vmem:[#allocation5 + $0x48] sm:$0xff]  ;;  %v69_v30 = vld [vmem:[#allocation5 + $0xd0] sm:$0xff]  ;;  %v70_v31 = vld [vmem:[#allocation5 + $0xd8] sm:$0xff]  ;;  %p294_p6 = pnand %p293_p5, %p287_p2 }
  0x2e   :  { %212 = vmatpush3.bf16.msra.mxu0 %v211_v13  ;;  %v223_v32 = vpack.c.bf16 %v52_v29, %v51_v28  ;;  %v225_v33 = vpack.c.bf16 %v70_v31, %v69_v30  ;;  %v53_v34 = vld [vmem:[#allocation5 + $0x50] sm:$0xff]  ;;  %v54_v35 = vld [vmem:[#allocation5 + $0x58] sm:$0xff]  ;;  %v71_v36 = vld [vmem:[#allocation5 + $0xe0] sm:$0xff] }
  0x2f   :  { %214 = vmatprep.subr.bf16.mxu0 %v213_v14  ;;  %v72_v37 = vld [vmem:[#allocation5 + $0xe8] sm:$0xff]  ;;  %v227_v38 = vpack.c.bf16 %v54_v35, %v53_v34  ;;  %v55_v40 = vld [vmem:[#allocation5 + $0x60] sm:$0xff]  ;;  %v73_v42 = vld [vmem:[#allocation5 + $0xf0] sm:$0xff] }
  0x30   :  { %v229_v39 = vpack.c.bf16 %v72_v37, %v71_v36  ;;  %v56_v41 = vld [vmem:[#allocation5 + $0x68] sm:$0xff]  ;;  %v74_v43 = vld [vmem:[#allocation5 + $0xf8] sm:$0xff]  ;;  %v57_v46 = vld [vmem:[#allocation5 + $0x70] sm:$0xff] }
  0x31   :  { %v231_v44 = vpack.c.bf16 %v56_v41, %v55_v40  ;;  %v233_v45 = vpack.c.bf16 %v74_v43, %v73_v42  ;;  %v58_v47 = vld [vmem:[#allocation5 + $0x78] sm:$0xff]  ;;  %v41_v49 = vld [vmem:[#allocation2] sm:$0xff] }
  0x32   :  { %216 = vmatpush3.bf16.msra.mxu0 %v215_v19  ;;  %v235_v48 = vpack.c.bf16 %v58_v47, %v57_v46  ;;  %v169_v51 = vld [vmem:[%s387_s2] ss:$0 sm:$0xff] }
  0x33   :  { %218 = vmatprep.subr.bf16.mxu0 %v217_v20 }
  0x36   :  { %220 = vmatpush3.bf16.msra.mxu0 %v219_v26 }
  0x37   :  { %222 = vmatprep.subr.bf16.mxu0 %v221_v27 }
  0x3a   :  { %224 = vmatpush3.bf16.msra.mxu0 %v223_v32 }
  0x3b   :  { %226 = vmatprep.subr.bf16.mxu0 %v225_v33 }
  0x3e   :  { %228 = vmatpush3.bf16.msra.mxu0 %v227_v38 }
  0x3f   :  { %230 = vmatprep.subr.bf16.mxu0 %v229_v39 }
  0x42   :  { %232 = vmatpush3.bf16.msra.mxu0 %v231_v44 }
  0x43   :  { %234 = vmatprep.subr.bf16.mxu0 %v233_v45 }
  0x46   :  { %236 = vmatpush3.bf16.msra.mxu0 %v235_v48 }
  0x49   :  { %147 = vmatmul.mubr.f32.vlgmr.msra.gmra.mrb[0].mxu0 %v41_v49 }
 0x11c   :  { %v202_v50 = vpop.f32.mrb[0].mxu0 }
 0x11d   :  { %v203_v52 = vpop.f32.mrb[1].mxu0 }
 0x11e   :  { %v204_v53 = vadd.f32 %v203_v52, %v202_v50 }
 0x120   :  { %v149_v54 = vadd.f32 %v204_v53, %v169_v51 }
 0x122   :  { %152 = vst [vmem:[#allocation7] sm:$0xff] %v149_v54 }
 0x123   :  { %297 = shalt.err (!%p294_p6)
}
 0x124   :  { %s298_s16 = scalar_lea.hbm %s388_s3, 128 }
 0x125   :  { %p299_p7 = scmp.ne.s32.totalorder %s388_s3, %s298_s16  ;;  %p302_p8 = scmp.lt.u32.totalorder %s298_s16, %s388_s3 }
 0x127   :  { %p304_p9 = pnand %p302_p8, %p299_p7 }
 0x129   :  { %307 = shalt.err (!%p304_p9)
}
 0x12a   :  { %162 = dma.vmem_to_hbm [thread:$0]  %s160_s12, 128, %s388_s3, [#allocation4]  }
 0x12b   :  { %312 = dma.done.wait [#allocation4], 128  }
 0x12c   :  { %313 = vsyncadd [#allocation4], 4294967168 }
 0x12d   :  { %166 = vsyncpa [#allocation3], 1 }
 0x12e   :  { %167 = vsyncpa [#allocation6], 1 }
 0x12f   :  { %168 = vsyncpa [#allocation4], 1 }

</bundles_post_ra>
